<compile_context>
chip_gen: v5e
topology: v5e:2x2
jax: 0.10.0
libtpu: 0.0.40
codegen_flags: <defaults>
</compile_context>

<pallas_src>
import functools
import math

import jax
import jax.numpy as jnp
from jax import lax
from jax.experimental import pallas as pl
from jax.experimental.pallas import tpu as pltpu


# ---------------------------------------------------------------------------
# Layout / sizing helpers (padded VMEM footprints, tile choices)
# ---------------------------------------------------------------------------

def _cdiv(a, b):
    return -(-a // b)


def _lcm(a, b):
    return a * b // math.gcd(a, b)


def _pad_lane(n):
    """Last-dim padding: VMEM tiles are 128-lane dense."""
    return _cdiv(max(n, 1), 128) * 128


def _pad_sub(n, itemsize):
    """Second-minor padding: 8 sublanes for 4-byte, 16 for 2-byte, 32 for 1-byte."""
    pack = 8 * max(1, 4 // max(1, itemsize))
    return _cdiv(max(n, 1), pack) * pack


def _vmem_limits():
    """(block-sizing budget, scoped vmem_limit_bytes); generation-aware when possible."""
    limit = 32 * 1024 * 1024  # safe default on every generation (incl. v7x: 64 MiB physical)
    try:
        cap = int(pltpu.get_tpu_info().vmem_capacity_bytes)
        # Use at most half of physical VMEM for this call's scoped window.
        limit = max(32 * 1024 * 1024, min(cap // 2, 96 * 1024 * 1024))
    except Exception:
        pass
    budget = (limit * 3) // 4  # headroom inside the scoped limit
    return budget, limit


def _pick_pt(D, PD):
    """Width of the flat (pred_len*D) output tile: a multiple of lcm(D,128), or full PD."""
    g = _lcm(D, 128)
    if PD <= max(g, 16384):
        return PD
    return g * max(1, 16384 // g)


def _batch_tile(B, num_p, fits, *, min_rows=8, target_steps=8):
    """Largest batch tile that fits the budget, capped so the grid keeps >= target_steps
    total steps (DMA/compute/writeback overlap; megacore) whenever B allows it."""
    if B <= min_rows:
        return B if fits(B) else None
    cap = B
    if B >= 2 * min_rows:
        need_nb = max(1, _cdiv(target_steps, num_p))
        cap = max(min_rows, (_cdiv(B, need_nb) // min_rows) * min_rows)
    start = (min(B, cap) // min_rows) * min_rows
    for tb in range(start, 0, -min_rows):
        if fits(tb):
            return tb
    return None


def _fused_footprint(tb, pt, L, D, in_dtype, out_dtype):
    isz = jnp.dtype(in_dtype).itemsize
    osz = jnp.dtype(out_dtype).itemsize
    in_blk = tb * _pad_sub(L, isz) * _pad_lane(D) * isz      # (tb, L, D) input block
    f32_tmp = tb * _pad_sub(L, 4) * _pad_lane(D) * 4         # upcast copy during the sum
    mean_scr = _pad_sub(tb, 4) * _pad_lane(D) * 4            # cached mean scratch
    out_blk = _pad_sub(tb, osz) * _pad_lane(pt) * osz        # (tb, pt) output block
    out_tmp = _pad_sub(tb, 4) * _pad_lane(pt) * 4            # tiled f32 value before cast
    return 2 * in_blk + f32_tmp + mean_scr + 2 * out_blk + out_tmp


def _reduce_footprint(tb, tl, D, in_dtype):
    isz = jnp.dtype(in_dtype).itemsize
    in_blk = tb * _pad_sub(tl, isz) * _pad_lane(D) * isz
    f32_tmp = tb * _pad_sub(tl, 4) * _pad_lane(D) * 4
    acc_scr = _pad_sub(tb, 4) * _pad_lane(D) * 4
    out_blk = _pad_sub(tb, 4) * _pad_lane(D) * 4
    return 2 * in_blk + f32_tmp + acc_scr + 2 * out_blk


def _bcast_footprint(tb, pt, D, out_dtype):
    osz = jnp.dtype(out_dtype).itemsize
    in_blk = _pad_sub(tb, 4) * _pad_lane(D) * 4
    out_blk = _pad_sub(tb, osz) * _pad_lane(pt) * osz
    out_tmp = _pad_sub(tb, 4) * _pad_lane(pt) * 4
    return 2 * in_blk + 2 * out_blk + out_tmp


# ---------------------------------------------------------------------------
# Kernels
# ---------------------------------------------------------------------------

def _fused_mean_tile_kernel(x_ref, o_ref, mean_ref, *, seq_len, reps):
    """x_ref: (tb, L, D); o_ref: (tb, pt) lane-dense flat output; mean_ref: (tb, D) f32.

    Grid = (batch tiles, flat-output tiles).  Mean is computed once per batch
    tile (p == 0) and cached; every p step re-tiles it into the next output slab.
    The input index_map is constant in p, so the input block is not re-DMA'd.
    """
    @pl.when(pl.program_id(1) == 0)
    def _compute_mean():
        x = x_ref[...].astype(jnp.float32)                    # (tb, L, D)
        mean_ref[...] = jnp.sum(x, axis=1) * (1.0 / seq_len)  # sum * const reciprocal
    o_ref[...] = jnp.tile(mean_ref[...], (1, reps)).astype(o_ref.dtype)


def _mean_reduce_kernel(x_ref, m_ref, acc_ref, *, seq_len, l_tile, need_mask):
    """L-split reduction.  x_ref: (tb, tl, D); m_ref: (tb, D) f32; acc_ref: (tb, D) f32."""
    k = pl.program_id(1)

    @pl.when(k == 0)
    def _init():
        acc_ref[...] = jnp.zeros_like(acc_ref)

    x = x_ref[...].astype(jnp.float32)
    if need_mask:  # zero padded rows of the partial last L tile
        pos = k * l_tile + lax.broadcasted_iota(jnp.int32, x.shape, 1)
        x = jnp.where(pos < seq_len, x, 0.0)
    acc_ref[...] += jnp.sum(x, axis=1)

    @pl.when(k == pl.num_programs(1) - 1)
    def _finalize():
        m_ref[...] = acc_ref[...] * (1.0 / seq_len)


def _broadcast_kernel(m_ref, o_ref, *, reps):
    """m_ref: (tb, D) f32 mean block; o_ref: (tb, pt) lane-dense flat output block."""
    o_ref[...] = jnp.tile(m_ref[...], (1, reps)).astype(o_ref.dtype)


# ---------------------------------------------------------------------------
# Wrappers
# ---------------------------------------------------------------------------

def _fused_forward(x_enc, pred_len, budget, limit, force_tiles=None):
    B, L, D = x_enc.shape
    PD = pred_len * D
    if force_tiles is not None:
        tb, pt = force_tiles
    else:
        pt = _pick_pt(D, PD)
        num_p = _cdiv(PD, pt)
        tb = _batch_tile(
            B, num_p,
            lambda t: _fused_footprint(t, pt, L, D, x_enc.dtype, x_enc.dtype) <= budget)
        if tb is None:
            return None                      # input tile too big -> two-pass fallback
    num_p = _cdiv(PD, pt)
    reps = pt // D
    grid = (_cdiv(B, tb), num_p)

    flat = pl.pallas_call(
        functools.partial(_fused_mean_tile_kernel, seq_len=L, reps=reps),
        out_shape=jax.ShapeDtypeStruct((B, PD), x_enc.dtype),
        grid=grid,
        in_specs=[pl.BlockSpec((tb, L, D), lambda b, p: (b, 0, 0))],
        out_specs=pl.BlockSpec((tb, pt), lambda b, p: (b, p)),
        scratch_shapes=[pltpu.VMEM((tb, D), jnp.float32)],
        compiler_params=pltpu.CompilerParams(
            dimension_semantics=("parallel", "arbitrary"),
            vmem_limit_bytes=limit,
        ),
    )(x_enc)
    return flat.reshape(B, pred_len, D)      # contiguous reshape: free


def _two_pass_forward(x_enc, pred_len, budget, limit, force_tiles=None):
    """Fallback for huge seq_len*enc_in: L-split mean reduction, then broadcast."""
    B, L, D = x_enc.shape
    PD = pred_len * D

    # ---- pass 1: mean over the sequence axis -> (B, D) f32 ----
    if force_tiles is not None:
        tb1, tl, tb2, pt = force_tiles
    else:
        tb1 = min(B, 8)
        tl = L
        while tl > 8 and _reduce_footprint(tb1, tl, D, x_enc.dtype) > budget:
            tl = max(8, (tl // 2 // 8) * 8)
    tl = min(tl, L)
    num_k = _cdiv(L, tl)
    need_mask = (L % tl) != 0

    mean = pl.pallas_call(
        functools.partial(_mean_reduce_kernel, seq_len=L, l_tile=tl, need_mask=need_mask),
        out_shape=jax.ShapeDtypeStruct((B, D), jnp.float32),
        grid=(_cdiv(B, tb1), num_k),
        in_specs=[pl.BlockSpec((tb1, tl, D), lambda b, k: (b, k, 0))],
        out_specs=pl.BlockSpec((tb1, D), lambda b, k: (b, 0)),
        scratch_shapes=[pltpu.VMEM((tb1, D), jnp.float32)],
        compiler_params=pltpu.CompilerParams(
            dimension_semantics=("parallel", "arbitrary"),
            vmem_limit_bytes=limit,
        ),
    )(x_enc)

    # ---- pass 2: tile the cached mean into the flat (B, pred_len*D) output ----
    if force_tiles is None:
        pt = _pick_pt(D, PD)
        num_p = _cdiv(PD, pt)
        tb2 = _batch_tile(
            B, num_p, lambda t: _bcast_footprint(t, pt, D, x_enc.dtype) <= budget)
        if tb2 is None:
            tb2 = min(B, 8)
    num_p = _cdiv(PD, pt)
    reps = pt // D

    flat = pl.pallas_call(
        functools.partial(_broadcast_kernel, reps=reps),
        out_shape=jax.ShapeDtypeStruct((B, PD), x_enc.dtype),
        grid=(_cdiv(B, tb2), num_p),
        in_specs=[pl.BlockSpec((tb2, D), lambda b, p: (b, 0))],
        out_specs=pl.BlockSpec((tb2, pt), lambda b, p: (b, p)),
        compiler_params=pltpu.CompilerParams(
            dimension_semantics=("parallel", "parallel"),
            vmem_limit_bytes=limit,
        ),
    )(mean)
    return flat.reshape(B, pred_len, D)


def mean_model_forward(x_enc, x_mark_enc, x_dec, x_mark_dec, *, pred_len,
                       force_fused_tiles=None):
    """Pallas equivalent of Model.forward (output_attention=False)."""
    del x_mark_enc, x_dec, x_mark_dec        # unused by the reference forward
    budget, limit = _vmem_limits()
    out = _fused_forward(x_enc, pred_len, budget, limit, force_tiles=force_fused_tiles)
    if out is None:
        out = _two_pass_forward(x_enc, pred_len, budget, limit)
    return out


if __name__ == "__main__":
    key = jax.random.PRNGKey(0)
    k1, k2, k3, k4, k5 = jax.random.split(key, 5)

    # --- Case 1: small config consistent with the module's __init__ fields (fused path) ---
    seq_len, label_len, pred_len = 8, 4, 4
    B, D = 2, 32
    x_enc = jax.random.normal(k1, (B, seq_len, D), dtype=jnp.float32)
    x_mark_enc = jax.random.normal(k2, (B, seq_len, 4), dtype=jnp.float32)
    x_dec = jax.random.normal(k3, (B, label_len + pred_len, D), dtype=jnp.float32)
    x_mark_dec = jax.random.normal(k4, (B, label_len + pred_len, 4), dtype=jnp.float32)

    out = mean_model_forward(x_enc, x_mark_enc, x_dec, x_mark_dec, pred_len=pred_len)
    out = jax.block_until_ready(out)
    ref = jnp.broadcast_to(jnp.mean(x_enc, axis=1, keepdims=True), (B, pred_len, D))
    assert out.shape == (B, pred_len, D), out.shape
    assert jnp.allclose(out, ref, atol=1e-5, rtol=1e-5), "fused path mismatch"

    # --- Case 2: fused path with batch + flat-output tiling and partial blocks ---
    B2, L2, D2, P2 = 10, 12, 32, 8
    x2 = jax.random.normal(k5, (B2, L2, D2), dtype=jnp.float32)
    out2 = mean_model_forward(x2, None, None, None, pred_len=P2,
                              force_fused_tiles=(8, 128))
    out2 = jax.block_until_ready(out2)
    ref2 = jnp.broadcast_to(jnp.mean(x2, axis=1, keepdims=True), (B2, P2, D2))
    assert jnp.allclose(out2, ref2, atol=1e-5, rtol=1e-5), "tiled fused path mismatch"

    # --- Case 3: two-pass fallback (L-reduction grid with masking + broadcast) ---
    budget, limit = _vmem_limits()
    out3 = _two_pass_forward(x2, P2, budget, limit, force_tiles=(8, 8, 8, 128))
    out3 = jax.block_until_ready(out3)
    assert jnp.allclose(out3, ref2, atol=1e-5, rtol=1e-5), "two-pass path mismatch"

    print("KERNEL_OK")
</pallas_src>

<mosaic_0001>
module attributes {stable_mosaic.version = 11 : i64} {
  func.func @_fused_mean_tile_kernel(%arg0: i32, %arg1: i32, %arg2: memref<2x8x32xf32, #tpu.memory_space<vmem>>, %arg3: memref<2x128xf32, #tpu.memory_space<vmem>>, %arg4: memref<2x32xf32, #tpu.memory_space<vmem>>) attributes {dimension_semantics = [#tpu.dimension_semantics<parallel>, #tpu.dimension_semantics<arbitrary>], iteration_bounds = array<i64: 1, 1>, scalar_prefetch = 0 : i64, scratch_operands = 1 : i64, tpu.core_type = #tpu.core_type<tc>, window_params = [{transform_indices = @transform_0, window_bounds = array<i64: 2, 8, 32>}, {transform_indices = @transform_1, window_bounds = array<i64: 2, 128>}]} {
    %c0_i32 = arith.constant 0 : i32
    %0 = arith.cmpi eq, %arg1, %c0_i32 : i32
    %1 = arith.extui %0 : i1 to i32
    %c0_i32_0 = arith.constant 0 : i32
    %2 = arith.cmpi ne, %1, %c0_i32_0 : i32
    scf.if %2 {
      %c0_4 = arith.constant 0 : index
      %c0_5 = arith.constant 0 : index
      %c0_6 = arith.constant 0 : index
      %6 = vector.load %arg2[%c0_4, %c0_5, %c0_6] : memref<2x8x32xf32, #tpu.memory_space<vmem>>, vector<2x8x32xf32>
      %cst = arith.constant dense<0.000000e+00> : vector<2x32xf32>
      %7 = vector.multi_reduction <add>, %6, %cst [1] : vector<2x8x32xf32> to vector<2x32xf32>
      %cst_7 = arith.constant 1.250000e-01 : f32
      %8 = vector.broadcast %cst_7 : f32 to vector<2x32xf32>
      %9 = arith.mulf %7, %8 : vector<2x32xf32>
      %c0_8 = arith.constant 0 : index
      %c0_9 = arith.constant 0 : index
      %10 = vector.load %arg4[%c0_8, %c0_9] : memref<2x32xf32, #tpu.memory_space<vmem>>, vector<2x32xf32>
      tpu.vector_store %arg4[%c0_8, %c0_9], %9 {strides = array<i32>} : memref<2x32xf32, #tpu.memory_space<vmem>>, vector<2x32xf32>,
    } else {
    }
    %c0 = arith.constant 0 : index
    %c0_1 = arith.constant 0 : index
    %3 = vector.load %arg4[%c0, %c0_1] : memref<2x32xf32, #tpu.memory_space<vmem>>, vector<2x32xf32>
    %4 = tpu.concatenate %3, %3, %3, %3 in 1 : vector<2x32xf32>, vector<2x32xf32>, vector<2x32xf32>, vector<2x32xf32> -> vector<2x128xf32>
    %c0_2 = arith.constant 0 : index
    %c0_3 = arith.constant 0 : index
    %5 = vector.load %arg3[%c0_2, %c0_3] : memref<2x128xf32, #tpu.memory_space<vmem>>, vector<2x128xf32>
    tpu.vector_store %arg3[%c0_2, %c0_3], %4 {strides = array<i32>} : memref<2x128xf32, #tpu.memory_space<vmem>>, vector<2x128xf32>,
    return
  }
  func.func @transform_0(%arg0: i32, %arg1: i32) -> (i32, i32, i32) {
    %c0_i32 = arith.constant 0 : i32
    %c0_i32_0 = arith.constant 0 : i32
    %c0_i32_1 = arith.constant 0 : i32
    return %arg0, %c0_i32, %c0_i32_0 : i32, i32, i32
  }
  func.func @transform_1(%arg0: i32, %arg1: i32) -> (i32, i32) {
    %c0_i32 = arith.constant 0 : i32
    return %arg0, %arg1 : i32, i32
  }
}

</mosaic_0001>

<bundles_post_ra>
// kernel: tpu_custom_call.1
= control target key start
LH: loop header
LB: loop body
LE: loop exit
PB: predicated region body
PF: predicated region fallthrough
CT: control target
= control target key end

     0   :  { %6 = vsyncpa [#allocation4], 0  ;;  %s175_s0 = inlined_call_operand.hbm [shape: f32[2,8,32], index: 0, kind: input, shape index: {}]   ;;  %s176_s1 = inlined_call_operand.hbm [shape: f32[2,128], index: 1, kind: output, shape index: {}]  }
   0x1   :  { %7 = vsyncpa [#allocation5], 0  ;;  %s12_s8 = sshll.u32 %s175_s0, 4  ;;  %s149_s9 = smov [#allocation3]   ;;  %s13_s8 = int_to_ptr.hbm [resolvable:$true] %s12_s8 }
   0x2   :  { %s14_s10 = sshll.u32 %s149_s9, 4  ;;  %s150_s11 = smov 128   ;;  %s15_s10 = int_to_ptr.vmem [resolvable:$true] %s14_s10 }
   0x3   :  { %s151_s12 = smov 8  }
   0x4   :  { %20 = dma.hbm_to_vmem [thread:$0]  %s13_s8, 256, %s15_s10, [#allocation4], %s150_s11, %s150_s11, %s151_s12  }
   0x5   :  { %145 = dma.done.wait [#allocation4], 256  }
   0x6   :  { %146 = vsyncadd [#allocation4], 4294967040  ;;  %vm31_vm0 = vcmask 261120   ;;  %v29_v0 = vld [vmem:[#allocation3] sm:$0xff]  ;;  %v30_v1 = vld [vmem:[#allocation3 + $0x8] sm:$0xff]  ;;  %vm50_vm1 = vcmask 1041409  }
   0x7   :  { %v32_v2 = vsel %vm31_vm0, %v29_v0, 0.0  ;;  %v39_v3 = vsel %vm31_vm0, %v30_v1, 0.0  ;;  %vm53_vm2 = vcmask 254976   ;;  %s152_s0 = smov 32   ;;  %s153_s13 = smov 96   ;;  %vm68_vm3 = vcmask 523264  }
   0x8   :  { %v33_v4 = vrot.slane %v32_v2, 4  ;;  %v40_v5 = vrot.slane %v39_v3, 4  ;;  %s154_s14 = smov 64   ;;  %s155_s15 = smov [#allocation6]   ;;  %vm70_vm4 = vcmask 785408  }
   0x9   :  { %s78_s16 = sshll.u32 %s155_s15, 4  ;;  %s80_s19 = sshll.u32 %s176_s1, 4  ;;  %s79_s16 = int_to_ptr.vmem [resolvable:$true] %s78_s16  ;;  %s81_s19 = int_to_ptr.hbm [resolvable:$true] %s80_s19 }
   0xa   :  { %v34_v6 = vadd.f32 %v33_v4, %v32_v2  ;;  %v41_v7 = vadd.f32 %v40_v5, %v39_v3 }
   0xc   :  { %v35_v8 = vrot.slane %v34_v6, 2  ;;  %v42_v9 = vrot.slane %v41_v7, 2 }
   0xe   :  { %v36_v10 = vadd.f32 %v35_v8, %v34_v6  ;;  %v43_v11 = vadd.f32 %v42_v9, %v41_v7 }
  0x10   :  { %v37_v12 = vrot.slane %v36_v10, 1  ;;  %v44_v13 = vrot.slane %v43_v11, 1 }
  0x12   :  { %v38_v14 = vadd.f32 %v37_v12, %v36_v10  ;;  %v45_v15 = vadd.f32 %v44_v13, %v43_v11 }
  0x14   :  { %v46_v16 = vmul.f32 0.125, %v38_v14  ;;  %v47_v17 = vmul.f32 0.125, %v45_v15 }
  0x16   :  { %v51_v18 = vsel %vm50_vm1, %v47_v17, %v46_v16 }
  0x17   :  { %54 = vst.msk [vmem:[#allocation2] sm:$0x3] %vm53_vm2, %v51_v18 }
  0x1e   :  { %v55_v19 = vld [vmem:[#allocation2] sm:$0x3] }
  0x1f   :  { %57 = vrot.lane.b32.xlu0 %v55_v19, %s152_s0  ;;  %63 = vrot.lane.b32.xlu1 %v55_v19, %s153_s13 }
  0x27   :  { %60 = vrot.lane.b32.xlu0 %v55_v19, %s154_s14 }
  0x91   :  { %v58_v20 = vpop.permute.xlu0 %57  ;;  %v64_v21 = vpop.permute.xlu1 %63 }
  0x92   :  { %v67_v22 = vsel %vm31_vm0, %v55_v19, %v58_v20 }
  0x99   :  { %v61_v23 = vpop.permute.xlu0 %60 }
  0x9a   :  { %v69_v24 = vsel %vm68_vm3, %v67_v22, %v61_v23 }
  0x9b   :  { %v71_v25 = vsel %vm70_vm4, %v69_v24, %v64_v21 }
  0x9c   :  { %72 = vst [vmem:[#allocation6] sm:$0x3] %v71_v25 }
  0x9d   :  { %83 = dma.vmem_to_hbm [thread:$0]  %s79_s16, 32, %s81_s19, [#allocation5]  }
  0x9e   :  { %147 = dma.done.wait [#allocation5], 32  }
  0x9f   :  { %148 = vsyncadd [#allocation5], 4294967264 }
  0xa0   :  { %88 = vsyncpa [#allocation4], 1 }
  0xa1   :  { %89 = vsyncpa [#allocation5], 1 }

</bundles_post_ra>
